<compile_context>
chip_gen: v5e
topology: v5e:2x2
jax: 0.10.0
libtpu: 0.0.40
codegen_flags: <defaults>
</compile_context>

<pallas_src>
import functools

import jax
import jax.numpy as jnp
from jax.experimental import pallas as pl
from jax.experimental.pallas import tpu as pltpu


def _round_up(x, m):
    return (x + m - 1) // m * m


# ------------------------------- kernels -----------------------------------


def _patch_gemm_kernel(x_ref, w_ref, b_ref, o_ref, *, rep):
    """W-resident GEMM: o = repeat_rows(x @ W^T + b, rep).  One MXU matmul per row tile."""
    y = jnp.dot(x_ref[...], w_ref[...], preferred_element_type=jnp.float32)
    y = (y + b_ref[...]).astype(o_ref.dtype)              # cast BEFORE the row-repeat
    if rep > 1:
        tm, tn = y.shape
        y = jnp.broadcast_to(y[:, None, :], (tm, rep, tn)).reshape(tm * rep, tn)
    o_ref[...] = y


def _patch_gemm_acc_kernel(x_ref, w_ref, b_ref, o_ref, acc_ref, *, rep):
    """K-tiled GEMM with resident f32 accumulator (only when W doesn't fit in VMEM)."""
    k = pl.program_id(2)

    @pl.when(k == 0)
    def _():
        acc_ref[...] = jnp.zeros_like(acc_ref)

    acc_ref[...] += jnp.dot(x_ref[...], w_ref[...], preferred_element_type=jnp.float32)

    @pl.when(k == pl.num_programs(2) - 1)
    def _():
        y = (acc_ref[...] + b_ref[...]).astype(o_ref.dtype)
        if rep > 1:
            tm, tn = y.shape
            y = jnp.broadcast_to(y[:, None, :], (tm, rep, tn)).reshape(tm * rep, tn)
        o_ref[...] = y


# ------------------------------- wrapper ------------------------------------


def _vmem_budget_bytes():
    """Per-generation VMEM capacity (conservative v7x 64 MiB fallback) and a ~70% budget."""
    cap = 64 << 20
    try:
        info = pltpu.get_tpu_info()
        cap_attr = getattr(info, "vmem_capacity_bytes", None)
        if cap_attr:
            cap = int(cap_attr)
    except Exception:
        pass
    return cap, int(cap * 0.70)


def patch_forward(x, w, b, factor, resample):
    """Patch.forward.  x: (B, T, C_in); w: (out_dim, in_dim); b: (out_dim,) or None."""
    if factor == 1:
        # factor == 1 => proj is nn.Identity and no resampling branch fires: passthrough.
        return x

    x = jnp.asarray(x)
    B, T, C_in = x.shape
    C_out = w.shape[0]
    assert C_out % factor == 0, "Output dimension must be divisible by factor."
    dtype = x.dtype
    itemsize = jnp.dtype(dtype).itemsize

    # ---- data-movement prep in XLA (one fused memory-bound pass) -----------------
    if resample == "down":
        rep = 1
        T_out = T // factor
        # torch: roll(f-1, dim=1); x[:, :f-1] = 0; avg_pool1d(kernel=stride=f), tail dropped.
        x_shift = jnp.concatenate(
            [jnp.zeros((B, factor - 1, C_in), dtype),
             x[:, : T_out * factor - (factor - 1)]],
            axis=1)
        x2d = jnp.mean(
            x_shift.reshape(B, T_out, factor, C_in), axis=2, dtype=jnp.float32
        ).astype(dtype).reshape(B * T_out, C_in)
        out_T = T_out
    elif resample == "up":
        rep = factor
        x2d = x.reshape(B * T, C_in)
        out_T = T * factor
    else:
        # No resampling branch fires in torch; just the linear projection.
        rep = 1
        x2d = x.reshape(B * T, C_in)
        out_T = T

    M = x2d.shape[0]

    # ---- pad to lane / sublane aligned shapes -------------------------------------
    C_in_p = _round_up(C_in, 128)
    C_out_p = _round_up(C_out, 128)

    w_t = jnp.asarray(w).astype(dtype).T                    # (C_in, C_out)
    if C_in_p != C_in or C_out_p != C_out:
        w_t = jnp.pad(w_t, ((0, C_in_p - C_in), (0, C_out_p - C_out)))
    if b is None:
        b2 = jnp.zeros((1, C_out_p), jnp.float32)
    else:
        b2 = jnp.pad(jnp.asarray(b).astype(jnp.float32).reshape(1, C_out),
                     ((0, 0), (0, C_out_p - C_out)))

    # ---- tile selection, gated on per-generation VMEM ------------------------------
    vmem_cap, budget = _vmem_budget_bytes()
    M_pad8 = _round_up(max(M, 1), 8)
    w_bytes = C_in_p * C_out_p * itemsize
    b_bytes = C_out_p * 4
    row_cands = sorted({min(c, M_pad8) for c in (512, 256, 128, 64, 32, 16, 8)},
                       reverse=True)

    cfg = None
    # Case A: W resident (full K, full N), single grid axis over row tiles.
    for tm in row_cands:
        x_blk = tm * C_in_p * itemsize
        o_blk = tm * rep * C_out_p * itemsize
        need = 2 * (w_bytes + b_bytes + x_blk + o_blk) + o_blk   # + epilogue temp slack
        if need <= budget:
            cfg = ("resident", tm, C_in_p, C_out_p)
            break

    if cfg is None:
        # Case B: W too big -> K-tiled accumulator path.
        tk = max(c for c in (512, 256, 128) if C_in_p % c == 0)
        tn = max(c for c in (512, 256, 128) if C_out_p % c == 0)
        for tm in row_cands:
            need = (2 * (tm * tk * itemsize + tk * tn * itemsize + b_bytes
                         + tm * rep * tn * itemsize)
                    + tm * rep * tn * itemsize + tm * tn * 4)
            if need <= budget:
                cfg = ("tiled", tm, tk, tn)
                break
        if cfg is None:
            cfg = ("tiled", row_cands[-1], tk, tn)

    mode, tm = cfg[0], cfg[1]

    M_p = _round_up(M, tm)
    pad_rows, pad_cols = M_p - M, C_in_p - C_in
    if pad_rows or pad_cols:
        x2d = jnp.pad(x2d, ((0, pad_rows), (0, pad_cols)))

    out_shape = jax.ShapeDtypeStruct((M_p * rep, C_out_p), dtype)

    if mode == "resident":
        grid = (M_p // tm,)
        in_specs = [
            pl.BlockSpec((tm, C_in_p), lambda i: (i, 0)),
            pl.BlockSpec((C_in_p, C_out_p), lambda i: (0, 0)),   # constant index -> one DMA
            pl.BlockSpec((1, C_out_p), lambda i: (0, 0)),
        ]
        out_specs = pl.BlockSpec((tm * rep, C_out_p), lambda i: (i, 0))
        scratch_shapes = []
        kernel = functools.partial(_patch_gemm_kernel, rep=rep)
        dim_sem = ("parallel",)
    else:
        _, tm, tk, tn = cfg
        grid = (M_p // tm, C_out_p // tn, C_in_p // tk)
        in_specs = [
            pl.BlockSpec((tm, tk), lambda i, j, k: (i, k)),
            pl.BlockSpec((tk, tn), lambda i, j, k: (k, j)),
            pl.BlockSpec((1, tn), lambda i, j, k: (0, j)),
        ]
        out_specs = pl.BlockSpec((tm * rep, tn), lambda i, j, k: (i, j))
        scratch_shapes = [pltpu.VMEM((tm, tn), jnp.float32)]
        kernel = functools.partial(_patch_gemm_acc_kernel, rep=rep)
        dim_sem = ("parallel", "parallel", "arbitrary")

    cost = pl.CostEstimate(
        flops=2 * M * C_in * C_out,
        transcendentals=0,
        bytes_accessed=int(x2d.size * itemsize + w_t.size * itemsize
                           + b2.size * 4 + M_p * rep * C_out_p * itemsize),
    )

    grid_spec = pltpu.PrefetchScalarGridSpec(
        num_scalar_prefetch=0,
        grid=grid,
        in_specs=in_specs,
        out_specs=out_specs,
        scratch_shapes=scratch_shapes,
    )
    out2d = pl.pallas_call(
        kernel,
        out_shape=out_shape,
        grid_spec=grid_spec,
        compiler_params=pltpu.CompilerParams(
            dimension_semantics=dim_sem,
            vmem_limit_bytes=budget),
        cost_estimate=cost,
    )(x2d, w_t, b2)

    return out2d[: M * rep, :C_out].reshape(B, out_T, C_out)


# ------------------------------ reference -----------------------------------


def patch_reference(x, w, b, factor, resample):
    """Pure-JAX mirror of the PyTorch forward (for correctness checking)."""
    if factor == 1:
        return x
    if resample == "down":
        f = factor
        B, T, C = x.shape
        T_out = T // f
        xr = jnp.roll(x, shift=f - 1, axis=1)
        xr = xr.at[:, : f - 1].set(0.0)
        x = xr[:, : T_out * f].reshape(B, T_out, f, C).mean(axis=2)
    elif resample == "up":
        x = jnp.repeat(x, factor, axis=1)
    y = x @ w.T
    if b is not None:
        y = y + b
    return y


# --------------------------------- test -------------------------------------


if __name__ == "__main__":
    def run_case(key, B, T, in_dim, out_dim, factor, use_bias):
        kx, kw, kb = jax.random.split(key, 3)
        x = jax.random.normal(kx, (B, T, in_dim), jnp.float32)
        bound = 1.0 / (in_dim ** 0.5)
        w = jax.random.uniform(kw, (out_dim, in_dim), jnp.float32, minval=-bound, maxval=bound)
        b = (jax.random.uniform(kb, (out_dim,), jnp.float32, minval=-bound, maxval=bound)
             if use_bias else None)
        ok = True
        for resample in ("down", "up"):
            out = jax.block_until_ready(patch_forward(x, w, b, factor, resample))
            ref = patch_reference(x, w, b, factor, resample)
            if out.shape != ref.shape or not bool(jnp.allclose(out, ref, rtol=2e-2, atol=2e-2)):
                ok = False
        return ok

    ok = run_case(jax.random.PRNGKey(0), B=2, T=8, in_dim=32, out_dim=64, factor=2, use_bias=True)
    # Second small config exercising padded channels and the no-bias path.
    ok = run_case(jax.random.PRNGKey(1), B=1, T=32, in_dim=1024, out_dim=256, factor=4,
                  use_bias=False) and ok
    # factor == 1 passthrough (nn.Identity).
    x1 = jax.random.normal(jax.random.PRNGKey(2), (2, 8, 32), jnp.float32)
    ok = ok and bool(jnp.allclose(patch_forward(x1, None, None, 1, "down"), x1))

    if ok:
        print("KERNEL_OK")
</pallas_src>

<mosaic_0001>
module attributes {stable_mosaic.version = 11 : i64} {
  func.func @_patch_gemm_kernel(%arg0: i32, %arg1: memref<8x128xf32, #tpu.memory_space<vmem>>, %arg2: memref<128x128xf32, #tpu.memory_space<vmem>>, %arg3: memref<1x128xf32, #tpu.memory_space<vmem>>, %arg4: memref<8x128xf32, #tpu.memory_space<vmem>>) attributes {dimension_semantics = [#tpu.dimension_semantics<parallel>], iteration_bounds = array<i64: 1>, scalar_prefetch = 0 : i64, scratch_operands = 0 : i64, tpu.core_type = #tpu.core_type<tc>, window_params = [{transform_indices = @transform_0, window_bounds = array<i64: 8, 128>}, {pipeline_mode = #tpu.pipeline_mode<synchronous>, transform_indices = @transform_1, window_bounds = array<i64: 128, 128>}, {pipeline_mode = #tpu.pipeline_mode<synchronous>, transform_indices = @transform_2, window_bounds = array<i64: 1, 128>}, {transform_indices = @transform_3, window_bounds = array<i64: 8, 128>}]} {
    %c0 = arith.constant 0 : index
    %c0_0 = arith.constant 0 : index
    %0 = vector.load %arg1[%c0, %c0_0] : memref<8x128xf32, #tpu.memory_space<vmem>>, vector<8x128xf32>
    %c0_1 = arith.constant 0 : index
    %c0_2 = arith.constant 0 : index
    %1 = vector.load %arg2[%c0_1, %c0_2] : memref<128x128xf32, #tpu.memory_space<vmem>>, vector<128x128xf32>
    %cst = arith.constant dense<0.000000e+00> : vector<8x128xf32>
    %2 = tpu.matmul %0, %1, %cst {dimension_numbers = #tpu.dot_dimension_numbers<[1], [0], [0], [1], [0, 0, 1, 1], [], []>} : vector<8x128xf32>, vector<128x128xf32>, vector<8x128xf32> -> vector<8x128xf32>
    %c0_3 = arith.constant 0 : index
    %c0_4 = arith.constant 0 : index
    %3 = vector.load %arg3[%c0_3, %c0_4] : memref<1x128xf32, #tpu.memory_space<vmem>>, vector<1x128xf32>
    %4 = vector.broadcast %3 : vector<1x128xf32> to vector<8x128xf32>
    %5 = arith.addf %2, %4 : vector<8x128xf32>
    %c0_5 = arith.constant 0 : index
    %c0_6 = arith.constant 0 : index
    %6 = vector.load %arg4[%c0_5, %c0_6] : memref<8x128xf32, #tpu.memory_space<vmem>>, vector<8x128xf32>
    tpu.vector_store %arg4[%c0_5, %c0_6], %5 {strides = array<i32>} : memref<8x128xf32, #tpu.memory_space<vmem>>, vector<8x128xf32>,
    return
  }
  func.func @transform_0(%arg0: i32) -> (i32, i32) {
    %c0_i32 = arith.constant 0 : i32
    %c0_i32_0 = arith.constant 0 : i32
    return %arg0, %c0_i32 : i32, i32
  }
  func.func @transform_1(%arg0: i32) -> (i32, i32) {
    %c0_i32 = arith.constant 0 : i32
    %c0_i32_0 = arith.constant 0 : i32
    %c0_i32_1 = arith.constant 0 : i32
    return %c0_i32, %c0_i32_0 : i32, i32
  }
  func.func @transform_2(%arg0: i32) -> (i32, i32) {
    %c0_i32 = arith.constant 0 : i32
    %c0_i32_0 = arith.constant 0 : i32
    %c0_i32_1 = arith.constant 0 : i32
    return %c0_i32, %c0_i32_0 : i32, i32
  }
  func.func @transform_3(%arg0: i32) -> (i32, i32) {
    %c0_i32 = arith.constant 0 : i32
    %c0_i32_0 = arith.constant 0 : i32
    return %arg0, %c0_i32 : i32, i32
  }
}

</mosaic_0001>

<bundles_post_ra>
// kernel: tpu_custom_call.1
= control target key start
LH: loop header
LB: loop body
LE: loop exit
PB: predicated region body
PF: predicated region fallthrough
CT: control target
= control target key end

     0   :  { %8 = vsyncpa [#allocation3], 0  ;;  %s226_s0 = inlined_call_operand.hbm [shape: f32[8,128], index: 0, kind: input, shape index: {}]   ;;  %s227_s1 = inlined_call_operand.hbm [shape: f32[128,128], index: 1, kind: input, shape index: {}]   ;;  %s228_s2 = inlined_call_operand.vmem [shape: f32[1,128], index: 2, kind: input, shape index: {}]   ;;  %s229_s3 = inlined_call_operand.hbm [shape: f32[8,128], index: 3, kind: output, shape index: {}]  }
   0x1   :  { %9 = vsyncpa [#allocation6], 0 }
   0x2   :  { %10 = vsyncpa [#allocation4], 0  ;;  %s16_s14 = sshll.u32 %s226_s0, 4  ;;  %s189_s15 = smov [#allocation2]   ;;  %s17_s14 = int_to_ptr.hbm [resolvable:$true] %s16_s14 }
   0x3   :  { %s18_s16 = sshll.u32 %s189_s15, 4  ;;  %s26_s19 = sshll.u32 %s227_s1, 4  ;;  %s19_s16 = int_to_ptr.vmem [resolvable:$true] %s18_s16  ;;  %s27_s19 = int_to_ptr.hbm [resolvable:$true] %s26_s19 }
   0x4   :  { %21 = dma.hbm_to_vmem [thread:$0]  %s17_s14, 128, %s19_s16, [#allocation3]  }
   0x5   :  { %s190_s20 = smov [#allocation5]   ;;  %s191_s22 = smov 128  }
   0x6   :  { %s28_s21 = sshll.u32 %s190_s20, 4  ;;  %s192_s23 = smov 8   ;;  %s29_s21 = int_to_ptr.vmem [resolvable:$true] %s28_s21 }
   0x7   :  { %34 = dma.hbm_to_vmem [thread:$0]  %s27_s19, 2048, %s29_s21, [#allocation6], %s191_s22, %s191_s22, %s192_s23  }
   0x8   :  { %183 = dma.done.wait [#allocation3], 128  }
   0x9   :  { %184 = vsyncadd [#allocation3], 4294967168 }
   0xa   :  { %185 = dma.done.wait [#allocation6], 2048  }
   0xb   :  { %186 = vsyncadd [#allocation6], 4294965248  ;;  %v61_v0 = vld [vmem:[#allocation5 + $0x78] sm:$0xff]  ;;  %v60_v1 = vld [vmem:[#allocation5 + $0x70] sm:$0xff]  ;;  %s193_s24 = smov [#allocation7]   ;;  %s94_s28 = sshll.u32 %s229_s3, 4  ;;  %s95_s28 = int_to_ptr.hbm [resolvable:$true] %s94_s28 }
   0xc   :  { %66 = vmatpush.msra.mxu0 %v61_v0  ;;  %v59_v2 = vld [vmem:[#allocation5 + $0x68] sm:$0xff]  ;;  %v58_v3 = vld [vmem:[#allocation5 + $0x60] sm:$0xff]  ;;  %v57_v4 = vld [vmem:[#allocation5 + $0x58] sm:$0xff]  ;;  %s92_s25 = sshll.u32 %s193_s24, 4  ;;  %s93_s25 = int_to_ptr.vmem [resolvable:$true] %s92_s25 }
   0xd   :  { %v56_v5 = vld [vmem:[#allocation5 + $0x50] sm:$0xff]  ;;  %v55_v6 = vld [vmem:[#allocation5 + $0x48] sm:$0xff]  ;;  %v54_v7 = vld [vmem:[#allocation5 + $0x40] sm:$0xff] }
   0xe   :  { %67 = vmatpush.msra.mxu0 %v60_v1  ;;  %v53_v8 = vld [vmem:[#allocation5 + $0x38] sm:$0xff]  ;;  %v52_v9 = vld [vmem:[#allocation5 + $0x30] sm:$0xff]  ;;  %v51_v10 = vld [vmem:[#allocation5 + $0x28] sm:$0xff] }
   0xf   :  { %v50_v11 = vld [vmem:[#allocation5 + $0x20] sm:$0xff]  ;;  %v49_v12 = vld [vmem:[#allocation5 + $0x18] sm:$0xff]  ;;  %v48_v13 = vld [vmem:[#allocation5 + $0x10] sm:$0xff] }
  0x10   :  { %68 = vmatpush.msra.mxu0 %v59_v2  ;;  %v47_v14 = vld [vmem:[#allocation5 + $0x8] sm:$0xff]  ;;  %v46_v15 = vld [vmem:[#allocation5] sm:$0xff]  ;;  %v45_v16 = vld [vmem:[#allocation2] sm:$0xff] }
  0x11   :  { %v110_v17 = vld [vmem:[%s228_s2] ss:$0 sm:$0xff] }
  0x12   :  { %69 = vmatpush.msra.mxu0 %v58_v3 }
  0x14   :  { %70 = vmatpush.msra.mxu0 %v57_v4 }
  0x16   :  { %71 = vmatpush.msra.mxu0 %v56_v5 }
  0x18   :  { %72 = vmatpush.msra.mxu0 %v55_v6 }
  0x1a   :  { %73 = vmatpush.msra.mxu0 %v54_v7 }
  0x1c   :  { %74 = vmatpush.msra.mxu0 %v53_v8 }
  0x1e   :  { %75 = vmatpush.msra.mxu0 %v52_v9 }
  0x20   :  { %76 = vmatpush.msra.mxu0 %v51_v10 }
  0x22   :  { %77 = vmatpush.msra.mxu0 %v50_v11 }
  0x24   :  { %78 = vmatpush.msra.mxu0 %v49_v12 }
  0x26   :  { %79 = vmatpush.msra.mxu0 %v48_v13 }
  0x28   :  { %80 = vmatpush.msra.mxu0 %v47_v14 }
  0x2a   :  { %81 = vmatpush.msra.mxu0 %v46_v15 }
  0x2b   :  { %82 = vmatmul.f32.vlgmr.msra.gmra.mxu0 %v45_v16 }
  0xa8   :  { %v83_v18 = vpop.f32.mrf.mxu0 }
  0xa9   :  { %v84_v19 = vadd.f32 %v110_v17, %v83_v18 }
  0xab   :  { %86 = vst [vmem:[#allocation7] sm:$0xff] %v84_v19 }
  0xac   :  { %97 = dma.vmem_to_hbm [thread:$0]  %s93_s25, 128, %s95_s28, [#allocation4]  }
  0xad   :  { %187 = dma.done.wait [#allocation4], 128  }
  0xae   :  { %188 = vsyncadd [#allocation4], 4294967168 }
  0xaf   :  { %102 = vsyncpa [#allocation3], 1 }
  0xb0   :  { %103 = vsyncpa [#allocation6], 1 }
  0xb1   :  { %104 = vsyncpa [#allocation4], 1 }

</bundles_post_ra>
